<compile_context>
chip_gen: v7x
topology: tpu7x:2x2x1
jax: 0.10.0
libtpu: 0.0.40
codegen_flags: <defaults>
</compile_context>

<pallas_src>
import jax
import jax.numpy as jnp
import numpy as np
from jax import lax
from jax.experimental import pallas as pl
from jax.experimental.pallas import tpu as pltpu


def _l2_normalize(x):
    # torch.nn.functional.normalize(p=2, dim=1): x / max(||x||_2, 1e-12)
    # rsqrt(max(sumsq, eps^2)) * x  ==  x / max(||x||, eps) within f32 tol.
    sumsq = jnp.sum(x * x, axis=1, keepdims=True)
    return x * lax.rsqrt(jnp.maximum(sumsq, 1e-24))


# ---------------------------------------------------------------------------
# Small-N path (N <= block_n): one block, exact f32 end-to-end.
# ---------------------------------------------------------------------------
def _make_single_block_kernel(inv_denom: float):
    def kernel(margin_ref, x_ref, o_ref):
        margin = margin_ref[0, 0]
        xn = _l2_normalize(x_ref[...].astype(jnp.float32))            # (N, D)
        # sim = xn @ xn.T, contracting dim 1 of both operands (no transpose).
        sim = lax.dot_general(xn, xn, (((1,), (1,)), ((), ())),
                              preferred_element_type=jnp.float32)     # (N, N)
        pen = jnp.maximum(jnp.abs(sim) - margin, 0.0)
        rows = lax.broadcasted_iota(jnp.int32, pen.shape, 0)
        cols = lax.broadcasted_iota(jnp.int32, pen.shape, 1)
        # Masked diagonal contributes relu(|0| - margin) in the reference.
        pen = jnp.where(rows == cols, jnp.maximum(-margin, 0.0), pen)
        o_ref[0, 0] = jnp.sum(pen) * inv_denom
    return kernel


# ---------------------------------------------------------------------------
# Large-N path: symmetric (upper-triangular) block schedule, bf16 MXU.
# ---------------------------------------------------------------------------
def _tri_kernel(iblk_ref, jblk_ref, margin_ref, xi_ref, xj_ref, out_ref):
    t = pl.program_id(0)
    ib = iblk_ref[t]
    jb = jblk_ref[t]
    margin = margin_ref[0, 0]

    xi = _l2_normalize(xi_ref[...].astype(jnp.float32))               # (tm, D)
    xj = _l2_normalize(xj_ref[...].astype(jnp.float32))               # (tn, D)

    # bf16 inputs for the MXU, f32 accumulation.
    sim = lax.dot_general(xi.astype(jnp.bfloat16), xj.astype(jnp.bfloat16),
                          (((1,), (1,)), ((), ())),
                          preferred_element_type=jnp.float32)         # (tm, tn)
    pen = jnp.maximum(jnp.abs(sim) - margin, 0.0)

    # Off-diagonal (upper-triangular) block stands in for both (i, j) and
    # (j, i) of the symmetric matrix -> weight 2.  Lane/sublane-dense store.
    out_ref[...] = jnp.broadcast_to(2.0 * jnp.sum(pen),
                                    out_ref.shape).astype(jnp.float32)

    # Diagonal block: counted once, and its own diagonal is masked exactly
    # like the reference (sim * (1 - eye) => relu(|0| - margin) there).
    @pl.when(ib == jb)
    def _diag_block():
        rows = lax.broadcasted_iota(jnp.int32, pen.shape, 0)
        cols = lax.broadcasted_iota(jnp.int32, pen.shape, 1)
        pen_d = jnp.where(rows == cols, jnp.maximum(-margin, 0.0), pen)
        out_ref[...] = jnp.broadcast_to(jnp.sum(pen_d),
                                        out_ref.shape).astype(jnp.float32)


def repulsion_loss(base_vectors: jax.Array, margin: float = 0.1,
                   *, block_n: int = 256) -> jax.Array:
    """Pallas TPU implementation of RepulsionLoss.forward. Returns a scalar."""
    n, d = base_vectors.shape
    inv_denom = 1.0 / float(max(n * (n - 1), 1))      # guard n == 1
    margin_arr = jnp.asarray(margin, dtype=jnp.float32).reshape(1, 1)
    smem = pl.BlockSpec(memory_space=pltpu.MemorySpace.SMEM)

    if n <= block_n:
        # One block, exact f32 (N^2 f32 is tiny for N <= block_n).
        out = pl.pallas_call(
            _make_single_block_kernel(inv_denom),
            out_shape=jax.ShapeDtypeStruct((1, 1), jnp.float32),
            in_specs=[smem, pl.BlockSpec((n, d), lambda: (0, 0))],
            out_specs=smem,
        )(margin_arr, base_vectors)
        return out[0, 0]

    # Pad N to a multiple of block_n with zero rows: they normalize to 0 and
    # contribute relu(-margin) = 0 per pair for the module's margin >= 0.
    # TODO(synk): mask padded rows if a negative margin ever needs bit-exact
    # support on the tiled path.
    g = pl.cdiv(n, block_n)
    n_pad = g * block_n
    x = base_vectors
    if n_pad != n:
        x = jnp.pad(x, ((0, n_pad - n), (0, 0)))

    # Upper-triangular block schedule (j >= i), scalar-prefetched.
    iblk_np, jblk_np = np.triu_indices(g)
    iblk = jnp.asarray(iblk_np, dtype=jnp.int32)
    jblk = jnp.asarray(jblk_np, dtype=jnp.int32)
    num_steps = int(iblk_np.shape[0])                 # g * (g + 1) // 2

    # VMEM budget: double-buffered (block_n, d) xi/xj input tiles + f32/bf16
    # normalized copies + the (block_n, block_n) sim/penalty temporaries.
    # TODO(synk): add an inner K (feature-dim) grid axis for d >= ~4K.
    itemsize = jnp.dtype(base_vectors.dtype).itemsize
    vmem_bytes = (2 * 2 * block_n * d * itemsize      # pipelined input tiles
                  + 2 * block_n * d * (4 + 2)         # f32 + bf16 normalized
                  + 3 * block_n * block_n * 4         # sim / penalty / mask
                  + (2 << 20))
    vmem_limit = int(min(max(vmem_bytes, 32 << 20), 64 << 20))

    out = pl.pallas_call(
        _tri_kernel,
        out_shape=jax.ShapeDtypeStruct((num_steps, 8, 128), jnp.float32),
        grid_spec=pltpu.PrefetchScalarGridSpec(
            num_scalar_prefetch=2,
            grid=(num_steps,),
            in_specs=[smem,
                      pl.BlockSpec((block_n, d), lambda t, ib, jb: (ib[t], 0)),
                      pl.BlockSpec((block_n, d), lambda t, ib, jb: (jb[t], 0))],
            out_specs=pl.BlockSpec((1, 8, 128), lambda t, ib, jb: (t, 0, 0)),
        ),
        compiler_params=pltpu.CompilerParams(
            dimension_semantics=("parallel",),
            vmem_limit_bytes=vmem_limit),
    )(iblk, jblk, margin_arr, x, x)

    return jnp.sum(out[:, 0, 0]) * inv_denom


def repulsion_loss_ref(base_vectors: jax.Array, margin: float = 0.1) -> jax.Array:
    """Pure-JAX reference matching the PyTorch module."""
    x = base_vectors.astype(jnp.float32)
    n = x.shape[0]
    norm = jnp.maximum(jnp.sqrt(jnp.sum(x * x, axis=1, keepdims=True)), 1e-12)
    xn = x / norm
    sim = xn @ xn.T
    sim = sim * (1.0 - jnp.eye(n, dtype=jnp.float32))
    return jnp.sum(jnp.maximum(jnp.abs(sim) - margin, 0.0)) / max(n * (n - 1), 1)


if __name__ == "__main__":
    key = jax.random.PRNGKey(0)
    k1, k2, k3 = jax.random.split(key, 3)

    # Small path: shapes consistent with the module (8 classes, 32-dim vectors).
    bv = jax.random.normal(k1, (8, 32), dtype=jnp.float32)
    bv = bv.at[3].set(0.0)    # zero row: exercises the clamped-norm case
    loss = jax.block_until_ready(repulsion_loss(bv, margin=0.1))
    ref = jax.block_until_ready(repulsion_loss_ref(bv, margin=0.1))
    assert jnp.allclose(loss, ref, atol=1e-5, rtol=1e-5), (loss, ref)

    # Tiled symmetric path: 2x2 row blocks -> 3 triangular steps, bf16 MXU.
    bv2 = jax.random.normal(k2, (256, 128), dtype=jnp.float32)
    loss2 = jax.block_until_ready(repulsion_loss(bv2, margin=0.1, block_n=128))
    ref2 = jax.block_until_ready(repulsion_loss_ref(bv2, margin=0.1))
    assert jnp.allclose(loss2, ref2, atol=2e-4, rtol=5e-3), (loss2, ref2)

    # Non-multiple N: zero-row padding path (300 -> 384, 6 triangular steps).
    bv3 = jax.random.normal(k3, (300, 64), dtype=jnp.float32)
    loss3 = jax.block_until_ready(repulsion_loss(bv3, margin=0.1, block_n=128))
    ref3 = jax.block_until_ready(repulsion_loss_ref(bv3, margin=0.1))
    assert jnp.allclose(loss3, ref3, atol=2e-4, rtol=5e-3), (loss3, ref3)

    print("KERNEL_OK")
</pallas_src>

<mosaic_0001>
module attributes {stable_mosaic.version = 11 : i64} {
  func.func @kernel(%arg0: memref<1x1xf32, #tpu.memory_space<smem>>, %arg1: memref<8x32xf32, #tpu.memory_space<vmem>>, %arg2: memref<1x1xf32, #tpu.memory_space<smem>>) attributes {dimension_semantics = [], scalar_prefetch = 0 : i64, scratch_operands = 0 : i64, tpu.core_type = #tpu.core_type<tc>} {
    %c0 = arith.constant 0 : index
    %c0_0 = arith.constant 0 : index
    %0 = memref.load %arg0[%c0, %c0_0] : memref<1x1xf32, #tpu.memory_space<smem>>
    %c0_1 = arith.constant 0 : index
    %c0_2 = arith.constant 0 : index
    %1 = vector.load %arg1[%c0_1, %c0_2] : memref<8x32xf32, #tpu.memory_space<vmem>>, vector<8x32xf32>
    %2 = arith.mulf %1, %1 : vector<8x32xf32>
    %cst = arith.constant dense<0.000000e+00> : vector<8xf32>
    %3 = vector.multi_reduction <add>, %2, %cst [1] : vector<8x32xf32> to vector<8xf32>
    %4 = vector.shape_cast %3 : vector<8xf32> to vector<8x1xf32>
    %cst_3 = arith.constant 1.000000e-24 : f32
    %5 = vector.broadcast %cst_3 : f32 to vector<8x1xf32>
    %6 = arith.maximumf %4, %5 : vector<8x1xf32>
    %7 = math.rsqrt %6 : vector<8x1xf32>
    %8 = vector.broadcast %7 : vector<8x1xf32> to vector<8x32xf32>
    %9 = arith.mulf %1, %8 : vector<8x32xf32>
    %cst_4 = arith.constant dense<0.000000e+00> : vector<8x8xf32>
    %10 = tpu.matmul %9, %9, %cst_4 {dimension_numbers = #tpu.dot_dimension_numbers<[1], [1], [0], [0], [0, 0, 1, 0], [], []>} : vector<8x32xf32>, vector<8x32xf32>, vector<8x8xf32> -> vector<8x8xf32>
    %11 = math.absf %10 : vector<8x8xf32>
    %12 = vector.broadcast %0 : f32 to vector<8x8xf32>
    %13 = arith.subf %11, %12 : vector<8x8xf32>
    %cst_5 = arith.constant 0.000000e+00 : f32
    %14 = vector.broadcast %cst_5 : f32 to vector<8x8xf32>
    %15 = arith.maximumf %13, %14 : vector<8x8xf32>
    %16 = tpu.iota {dimensions = array<i32: 0>} : vector<8x8xi32>
    %17 = tpu.iota {dimensions = array<i32: 1>} : vector<8x8xi32>
    %18 = arith.cmpi eq, %16, %17 : vector<8x8xi32>
    %cst_6 = arith.constant 0.000000e+00 : f32
    %19 = arith.subf %cst_6, %0 : f32
    %cst_7 = arith.constant 0.000000e+00 : f32
    %20 = arith.maximumf %19, %cst_7 : f32
    %21 = vector.broadcast %20 : f32 to vector<8x8xf32>
    %22 = arith.select %18, %21, %15 : vector<8x8xi1>, vector<8x8xf32>
    %23 = vector.shape_cast %22 : vector<8x8xf32> to vector<1x8x8xf32>
    %cst_8 = arith.constant dense<0.000000e+00> : vector<1xf32>
    %24 = vector.multi_reduction <add>, %23, %cst_8 [1, 2] : vector<1x8x8xf32> to vector<1xf32>
    %25 = vector.shape_cast %24 : vector<1xf32> to vector<1x1x1xf32>
    %26 = vector.extract %25[0, 0, 0] : f32 from vector<1x1x1xf32>
    %cst_9 = arith.constant 0.0178571437 : f32
    %27 = arith.mulf %26, %cst_9 : f32
    %c0_10 = arith.constant 0 : index
    %c0_11 = arith.constant 0 : index
    %28 = memref.load %arg2[%c0_10, %c0_11] : memref<1x1xf32, #tpu.memory_space<smem>>
    memref.store %27, %arg2[%c0_10, %c0_11] : memref<1x1xf32, #tpu.memory_space<smem>>
    return
  }
}

</mosaic_0001>

<bundles_post_ra>
// kernel: tpu_custom_call.1
= control target key start
LH: loop header
LB: loop body
LE: loop exit
PB: predicated region body
PF: predicated region fallthrough
CT: control target
= control target key end

     0   :  { %8 = vsyncpa [#allocation4], 0  ;;  %s253_s0 = inlined_call_operand.<no memory space> [shape: f32[1,1], index: 0, kind: input, shape index: {}]   ;;  %s254_s1 = inlined_call_operand.hbm [shape: f32[8,32], index: 1, kind: input, shape index: {}]   ;;  %s255_s2 = inlined_call_operand.hbm [shape: f32[1,1], index: 2, kind: output, shape index: {}]  }
   0x1   :  { %9 = vsyncpa [#allocation5], 0  ;;  %s203_s9 = smov [#allocation3]   ;;  %s167_s13 = scalar_lea.hbm %s254_s1, 128 }
   0x2   :  { %s18_s10 = sshll.u32 %s203_s9, 4  ;;  %p168_p0 = scmp.ne.s32.totalorder %s254_s1, %s167_s13  ;;  %s19_s10 = int_to_ptr.vmem [resolvable:$true] %s18_s10 }
   0x3   :  { %p171_p1 = scmp.lt.u32.totalorder %s167_s13, %s254_s1 }
   0x5   :  { %p173_p2 = pnand %p171_p1, %p168_p0 }
   0x7   :  { %176 = shalt.err (!%p173_p2)
}
   0x8   :  { %s177_s18 = scalar_lea.vmem %s19_s10, 128  ;;  %p182_p4 = scmp.lt.s32.totalorder %s19_s10, %s19_s10 }
   0x9   :  { %p178_p3 = scmp.ne.s32.totalorder %s19_s10, %s177_s18  ;;  %p183_p5 = scmp.lt.s32.totalorder %s177_s18, %s177_s18 }
   0xb   :  { %p184_p6 = por %p183_p5, %p182_p4 }
   0xd   :  { %p185_p7 = pnand %p184_p6, %p178_p3 }
   0xf   :  { %188 = shalt.err (!%p185_p7)
}
  0x10   :  { %21 = dma.hbm_to_vmem [thread:$0]  %s254_s1, 128, %s19_s10, [#allocation4]  }
  0x11   :  { %199 = dma.done.wait [#allocation4], 128  }
  0x12   :  { %200 = vsyncadd [#allocation4], 4294967168  ;;  %v26_v0 = vld [vmem:[#allocation3] sm:$0xff]  ;;  %vm28_vm0 = vcmask 261120   ;;  %v204_v3 = vmov 0.0   ;;  %vm205_vm1 = vmmov 0   ;;  %v112_v8 = vlaneseq }
  0x13   :  { %v27_v1 = vmul.f32 %v26_v0, %v26_v0  ;;  %153 = vmatprep.subr.mxu0 %v204_v3  ;;  %155 = vmatprep.mubr.msk.f32.mxu0 %vm205_vm1, %v204_v3  ;;  %s117_s22 = ssub.f32 0.0, %s253_s0  ;;  %v109_v10 = vstv %s253_s0  ;;  %s206_s25 = smov 0.0   ;;  %vm121_vm3 = vcmask 64512  }
  0x14   :  { %v113_v11 = vshrl.u32 %v112_v8, 7  ;;  %v115_v12 = vand.u32 127, %v112_v8  ;;  %s189_s30 = scalar_lea.hbm %s255_s2, 16 }
  0x15   :  { %v29_v2 = vsel %vm28_vm0, %v27_v1, 0.0  ;;  %s118_s26 = smax.f32 %s206_s25, %s117_s22  ;;  %p190_p8 = scmp.ne.s32.totalorder %s255_s2, %s189_s30 }
  0x16   :  { %30 = vadd.xlane.f32.xlu0 %v29_v2  ;;  %vm116_vm2 = vcmp.eq.s32.totalorder %v113_v11, %v115_v12  ;;  %v119_v16 = vstv %s118_s26  ;;  %p193_p9 = scmp.lt.u32.totalorder %s189_s30, %s255_s2 }
  0x18   :  { %p195_p10 = pnand %p193_p9, %p190_p8 }
  0xa3   :  { %v31_v4 = vpop.xlane.xlu0 %30 }
  0xa4   :  { %v32_v5 = vmax.f32 %v31_v4, 1e-24 }
  0xa6   :  { %165 = vrsqrt.f32 %v32_v5 }
  0xb0   :  { %v166_v6 = vpop.eup %165 }
  0xb1   :  { %v34_v7 = vmul.f32 %v166_v6, %v26_v0 }
  0xb3   :  { %154 = vmatpush3.xpose.msk.msra.mxu0 %vm28_vm0, %v34_v7 }
  0xb6   :  { %156 = vmatmul.mubr.msk.f32.vlgmr.msra.gmra.mrb[0].mxu0 %vm28_vm0, %v34_v7 }
 0x189   :  { %v104_v9 = vpop.f32.mrb[0].mxu0 }
 0x18a   :  { %v108_v13 = vand.u32 2147483647, %v104_v9  ;;  %v157_v14 = vpop.f32.mrb[1].mxu0 }
 0x18c   :  { %v110_v15 = vsub.f32 %v108_v13, %v109_v10 }
 0x18e   :  { %v111_v17 = vmax.f32 %v110_v15, 0.0 }
 0x190   :  { %v120_v18 = vsel %vm116_vm2, %v119_v16, %v111_v17 }
 0x191   :  { %v122_v19 = vsel %vm121_vm3, %v120_v18, 0.0 }
 0x192   :  { %123 = vadd.xlane.f32.xlu0 %v122_v19 }
 0x21f   :  { %v124_v20 = vpop.xlane.xlu0 %123 }
 0x220   :  { %v125_v21 = vrot.slane %v124_v20, 4 }
 0x222   :  { %v126_v22 = vadd.f32 %v125_v21, %v124_v20 }
 0x224   :  { %v127_v23 = vrot.slane %v126_v22, 2 }
 0x226   :  { %v128_v24 = vadd.f32 %v127_v23, %v126_v22 }
 0x228   :  { %v129_v25 = vrot.slane %v128_v24, 1 }
 0x22a   :  { %v130_v26 = vadd.f32 %v129_v25, %v128_v24 }
 0x22c   :  { %158 = vpush %v130_v26 }
 0x25d   :  { %s159_s0 = spop %158 }
 0x25e   :  { %s132_s27 = smul.f32 0.017857144, %s159_s0 }
 0x260   :  { %134 = sst [smem:[#allocation6]] %s132_s27 }
 0x261   :  { %198 = shalt.err (!%p195_p10)
}
 0x262   :  { %s207_s7 = smov [#allocation6]  }
 0x263   :  { %142 = dma.smem_to_hbm %s207_s7, 16, %s255_s2, [#allocation5]  }
 0x264   :  { %201 = dma.done.wait [#allocation5], 16  }
 0x265   :  { %202 = vsyncadd [#allocation5], 4294967280 }
 0x266   :  { %146 = sfence }
 0x267   :  { %147 = vsyncpa [#allocation4], 1 }
 0x268   :  { %148 = vsyncpa [#allocation5], 1 }

</bundles_post_ra>
